<compile_context>
chip_gen: v7x
topology: tpu7x:2x2x1
jax: 0.10.0
libtpu: 0.0.40
codegen_flags: <defaults>
</compile_context>

<pallas_src>
import jax
import jax.numpy as jnp
from jax.experimental import pallas as pl
from jax.experimental.pallas import tpu as pltpu

# ----------------------------- configuration --------------------------------
EMBED_DIM = 32
HIDDEN_DIM = 32
VOCAB_SIZE = 64
V_PAD = 128                                      # lane-dense output width
NUM_LAYERS = 1                                   # only num_layers=1 supported
BATCH = 2
IMG_C, IMG_H, IMG_W = 3, 16, 16
PATCH = 4
N_PATCH = (IMG_H // PATCH) * (IMG_W // PATCH)    # 16 patches
P_DIM = IMG_C * PATCH * PATCH                    # 48
SEQ = 8                                          # caption length
T_TOTAL = SEQ + 1                                # image feature prepended


# --------------------------- fused captioner kernel --------------------------
def captioner_kernel(cap_ref,                       # (SEQ*B, 1) int32, time-major rows (t*B + b)
                     pmean_ref,                     # (B, P)   mean-pooled patches
                     w_patch_ref, b_patch_ref,      # (P, E), (1, E)
                     emb_ref,                       # (V, E)   embedding table
                     w_ih_ref, w_hh_ref, b_g_ref,   # (E, 4H), (H, 4H), (1, 4H)
                     w_fc_ref, b_fc_ref,            # (H, V_PAD), (1, V_PAD)
                     out_ref,                       # (T_TOTAL*B, V_PAD)
                     h_all_scr):                    # VMEM (T_TOTAL*B, H)
    B = pmean_ref.shape[0]
    H = w_hh_ref.shape[0]

    # 1) image encoder + mean pool (mean folded before the linear in wrapper)
    feat = jnp.dot(pmean_ref[...], w_patch_ref[...],
                   preferred_element_type=jnp.float32) + b_patch_ref[...]     # (B, E)

    # 2) embedding lookup as one exact one-hot MXU matmul
    ids = cap_ref[...]                                                        # (SEQ*B, 1) int32
    onehot = (ids == jax.lax.broadcasted_iota(
        jnp.int32, (SEQ * B, VOCAB_SIZE), 1)).astype(jnp.float32)             # (SEQ*B, V)
    emb_x = jnp.dot(onehot, emb_ref[...],
                    preferred_element_type=jnp.float32)                       # (SEQ*B, E)

    # 3) input projection hoisted for all timesteps (lane-dense 4H = 128)
    feat_g = jnp.dot(feat, w_ih_ref[...],
                     preferred_element_type=jnp.float32) + b_g_ref[...]       # (B, 4H)
    cap_g = jnp.dot(emb_x, w_ih_ref[...],
                    preferred_element_type=jnp.float32) + b_g_ref[...]        # (SEQ*B, 4H)

    # 4) LSTM recurrence (statically unrolled; h/c carried as values)
    h = jnp.zeros((B, H), jnp.float32)
    c = jnp.zeros((B, H), jnp.float32)
    for t in range(T_TOTAL):
        xg_t = feat_g if t == 0 else cap_g[(t - 1) * B:t * B, :]
        g_all = xg_t + jnp.dot(h, w_hh_ref[...],
                               preferred_element_type=jnp.float32)            # (B, 4H)
        i_g = jax.nn.sigmoid(g_all[:, 0:H])
        f_g = jax.nn.sigmoid(g_all[:, H:2 * H])
        g_g = jnp.tanh(g_all[:, 2 * H:3 * H])
        o_g = jax.nn.sigmoid(g_all[:, 3 * H:4 * H])
        c = f_g * c + i_g * g_g
        h = o_g * jnp.tanh(c)
        h_all_scr[t * B:(t + 1) * B, :] = h

    # 5) vocab projection for all steps at once; V padded to 128 lanes so the
    #    output store is a full-lane (unmasked) vst.
    out_ref[...] = jnp.dot(h_all_scr[...], w_fc_ref[...],
                           preferred_element_type=jnp.float32) + b_fc_ref[...]


def _full_spec(shape):
    zeros = (0,) * len(shape)
    return pl.BlockSpec(shape, lambda i: zeros)


def fused_captioner(cap_ids, pmean, w_patch, b_patch, embedding,
                    w_ih, w_hh, b_gates, w_fc_pad, b_fc_pad):
    B = pmean.shape[0]
    return pl.pallas_call(
        captioner_kernel,
        out_shape=jax.ShapeDtypeStruct((T_TOTAL * B, V_PAD), jnp.float32),
        grid_spec=pltpu.PrefetchScalarGridSpec(
            num_scalar_prefetch=0,
            grid=(1,),
            in_specs=[
                _full_spec((SEQ * B, 1)),                     # caption ids
                _full_spec((B, P_DIM)),
                _full_spec((P_DIM, EMBED_DIM)),
                _full_spec((1, EMBED_DIM)),
                _full_spec((VOCAB_SIZE, EMBED_DIM)),
                _full_spec((EMBED_DIM, 4 * HIDDEN_DIM)),
                _full_spec((HIDDEN_DIM, 4 * HIDDEN_DIM)),
                _full_spec((1, 4 * HIDDEN_DIM)),
                _full_spec((HIDDEN_DIM, V_PAD)),
                _full_spec((1, V_PAD)),
            ],
            out_specs=_full_spec((T_TOTAL * B, V_PAD)),
            scratch_shapes=[
                pltpu.VMEM((T_TOTAL * B, HIDDEN_DIM), jnp.float32),  # stacked h_t
            ],
        ),
        compiler_params=pltpu.CompilerParams(
            dimension_semantics=("arbitrary",)),
    )(cap_ids, pmean, w_patch, b_patch, embedding,
      w_ih, w_hh, b_gates, w_fc_pad, b_fc_pad)


# ------------------------------- parameters ----------------------------------
def init_params(key):
    ks = jax.random.split(key, 8)
    scale = 0.05
    return {
        # ImageEncoder: Conv2d(C, E, kernel=stride=PATCH) flattened to (P, E)
        "w_patch": scale * jax.random.normal(ks[0], (P_DIM, EMBED_DIM), jnp.float32),
        "b_patch": scale * jax.random.normal(ks[1], (1, EMBED_DIM), jnp.float32),
        # TextDecoder (gates fused along the last dim in PyTorch order i, f, g, o)
        "embedding": jax.random.normal(ks[2], (VOCAB_SIZE, EMBED_DIM), jnp.float32),
        "w_ih": scale * jax.random.normal(ks[3], (EMBED_DIM, 4 * HIDDEN_DIM), jnp.float32),
        "w_hh": scale * jax.random.normal(ks[4], (HIDDEN_DIM, 4 * HIDDEN_DIM), jnp.float32),
        "b_gates": scale * jax.random.normal(ks[5], (1, 4 * HIDDEN_DIM), jnp.float32),
        "w_fc": scale * jax.random.normal(ks[6], (HIDDEN_DIM, VOCAB_SIZE), jnp.float32),
        "b_fc": scale * jax.random.normal(ks[7], (1, VOCAB_SIZE), jnp.float32),
    }


# ------------------------------ full forward ---------------------------------
def image_captioning_forward(images, captions, params):
    # images: (B, C, H, W) NCHW, captions: (B, T) int
    B, C, H, W = images.shape
    ps = PATCH
    # glue: extract non-overlapping patches (im2col of the stride-ps conv) and
    # fold the mean over patches BEFORE the linear (linearity => identical result)
    x = images.reshape(B, C, H // ps, ps, W // ps, ps)
    x = jnp.transpose(x, (0, 2, 4, 1, 3, 5))               # (B, Hp, Wp, C, ps, ps)
    patches = x.reshape(B, N_PATCH, P_DIM)
    pmean = jnp.mean(patches, axis=1)                      # (B, P)

    # pad the vocab projection to 128 lanes (padded logits are exactly 0)
    w_fc_pad = jnp.zeros((HIDDEN_DIM, V_PAD), jnp.float32).at[:, :VOCAB_SIZE].set(params["w_fc"])
    b_fc_pad = jnp.zeros((1, V_PAD), jnp.float32).at[:, :VOCAB_SIZE].set(params["b_fc"])

    # caption ids, time-major rows: row = t*B + b  -> captions[b, t]
    cap_ids = jnp.transpose(captions.astype(jnp.int32), (1, 0)).reshape(SEQ * B, 1)

    logits_flat = fused_captioner(
        cap_ids, pmean, params["w_patch"], params["b_patch"],
        params["embedding"], params["w_ih"], params["w_hh"], params["b_gates"],
        w_fc_pad, b_fc_pad)                                  # (T_TOTAL*B, V_PAD)

    logits = logits_flat.reshape(T_TOTAL, B, V_PAD)
    logits = jnp.transpose(logits, (1, 0, 2))[:, :, :VOCAB_SIZE]   # (B, T+1, V)
    return logits


# ----------------------------------- main ------------------------------------
if __name__ == "__main__":
    key = jax.random.PRNGKey(0)
    k_img, k_cap, k_par = jax.random.split(key, 3)

    images = jax.random.normal(k_img, (BATCH, IMG_C, IMG_H, IMG_W), jnp.float32)
    captions = jax.random.randint(k_cap, (BATCH, SEQ), 0, VOCAB_SIZE, jnp.int32)
    params = init_params(k_par)

    out = image_captioning_forward(images, captions, params)
    out = jax.block_until_ready(out)

    assert out.shape == (BATCH, T_TOTAL, VOCAB_SIZE), out.shape
    assert bool(jnp.all(jnp.isfinite(out)))
    print("KERNEL_OK")
</pallas_src>

<mosaic_0001>
module attributes {stable_mosaic.version = 11 : i64} {
  func.func @captioner_kernel(%arg0: i32, %arg1: memref<16x1xi32, #tpu.memory_space<vmem>>, %arg2: memref<2x48xf32, #tpu.memory_space<vmem>>, %arg3: memref<48x32xf32, #tpu.memory_space<vmem>>, %arg4: memref<1x32xf32, #tpu.memory_space<vmem>>, %arg5: memref<64x32xf32, #tpu.memory_space<vmem>>, %arg6: memref<32x128xf32, #tpu.memory_space<vmem>>, %arg7: memref<32x128xf32, #tpu.memory_space<vmem>>, %arg8: memref<1x128xf32, #tpu.memory_space<vmem>>, %arg9: memref<32x128xf32, #tpu.memory_space<vmem>>, %arg10: memref<1x128xf32, #tpu.memory_space<vmem>>, %arg11: memref<18x128xf32, #tpu.memory_space<vmem>>, %arg12: memref<18x32xf32, #tpu.memory_space<vmem>>) attributes {dimension_semantics = [#tpu.dimension_semantics<arbitrary>], iteration_bounds = array<i64: 1>, scalar_prefetch = 0 : i64, scratch_operands = 1 : i64, tpu.core_type = #tpu.core_type<tc>, window_params = [{pipeline_mode = #tpu.pipeline_mode<synchronous>, transform_indices = @transform_0, window_bounds = array<i64: 16, 1>}, {pipeline_mode = #tpu.pipeline_mode<synchronous>, transform_indices = @transform_1, window_bounds = array<i64: 2, 48>}, {pipeline_mode = #tpu.pipeline_mode<synchronous>, transform_indices = @transform_2, window_bounds = array<i64: 48, 32>}, {pipeline_mode = #tpu.pipeline_mode<synchronous>, transform_indices = @transform_3, window_bounds = array<i64: 1, 32>}, {pipeline_mode = #tpu.pipeline_mode<synchronous>, transform_indices = @transform_4, window_bounds = array<i64: 64, 32>}, {pipeline_mode = #tpu.pipeline_mode<synchronous>, transform_indices = @transform_5, window_bounds = array<i64: 32, 128>}, {pipeline_mode = #tpu.pipeline_mode<synchronous>, transform_indices = @transform_6, window_bounds = array<i64: 32, 128>}, {pipeline_mode = #tpu.pipeline_mode<synchronous>, transform_indices = @transform_7, window_bounds = array<i64: 1, 128>}, {pipeline_mode = #tpu.pipeline_mode<synchronous>, transform_indices = @transform_8, window_bounds = array<i64: 32, 128>}, {pipeline_mode = #tpu.pipeline_mode<synchronous>, transform_indices = @transform_9, window_bounds = array<i64: 1, 128>}, {pipeline_mode = #tpu.pipeline_mode<synchronous>, transform_indices = @transform_10, window_bounds = array<i64: 18, 128>}]} {
    %c0 = arith.constant 0 : index
    %c0_0 = arith.constant 0 : index
    %0 = vector.load %arg2[%c0, %c0_0] : memref<2x48xf32, #tpu.memory_space<vmem>>, vector<2x48xf32>
    %c0_1 = arith.constant 0 : index
    %c0_2 = arith.constant 0 : index
    %1 = vector.load %arg3[%c0_1, %c0_2] : memref<48x32xf32, #tpu.memory_space<vmem>>, vector<48x32xf32>
    %cst = arith.constant dense<0.000000e+00> : vector<2x32xf32>
    %2 = tpu.matmul %0, %1, %cst {dimension_numbers = #tpu.dot_dimension_numbers<[1], [0], [0], [1], [0, 0, 1, 1], [], []>} : vector<2x48xf32>, vector<48x32xf32>, vector<2x32xf32> -> vector<2x32xf32>
    %c0_3 = arith.constant 0 : index
    %c0_4 = arith.constant 0 : index
    %3 = vector.load %arg4[%c0_3, %c0_4] : memref<1x32xf32, #tpu.memory_space<vmem>>, vector<1x32xf32>
    %4 = vector.broadcast %3 : vector<1x32xf32> to vector<2x32xf32>
    %5 = arith.addf %2, %4 : vector<2x32xf32>
    %c0_5 = arith.constant 0 : index
    %c0_6 = arith.constant 0 : index
    %6 = vector.load %arg1[%c0_5, %c0_6] : memref<16x1xi32, #tpu.memory_space<vmem>>, vector<16x1xi32>
    %7 = tpu.iota {dimensions = array<i32: 1>} : vector<16x64xi32>
    %8 = vector.broadcast %6 : vector<16x1xi32> to vector<16x64xi32>
    %9 = arith.cmpi eq, %8, %7 : vector<16x64xi32>
    %10 = arith.extui %9 : vector<16x64xi1> to vector<16x64xi32>
    %11 = arith.sitofp %10 : vector<16x64xi32> to vector<16x64xf32>
    %c0_7 = arith.constant 0 : index
    %c0_8 = arith.constant 0 : index
    %12 = vector.load %arg5[%c0_7, %c0_8] : memref<64x32xf32, #tpu.memory_space<vmem>>, vector<64x32xf32>
    %cst_9 = arith.constant dense<0.000000e+00> : vector<16x32xf32>
    %13 = tpu.matmul %11, %12, %cst_9 {dimension_numbers = #tpu.dot_dimension_numbers<[1], [0], [0], [1], [0, 0, 1, 1], [], []>} : vector<16x64xf32>, vector<64x32xf32>, vector<16x32xf32> -> vector<16x32xf32>
    %c0_10 = arith.constant 0 : index
    %c0_11 = arith.constant 0 : index
    %14 = vector.load %arg6[%c0_10, %c0_11] : memref<32x128xf32, #tpu.memory_space<vmem>>, vector<32x128xf32>
    %cst_12 = arith.constant dense<0.000000e+00> : vector<2x128xf32>
    %15 = tpu.matmul %5, %14, %cst_12 {dimension_numbers = #tpu.dot_dimension_numbers<[1], [0], [0], [1], [0, 0, 1, 1], [], []>} : vector<2x32xf32>, vector<32x128xf32>, vector<2x128xf32> -> vector<2x128xf32>
    %c0_13 = arith.constant 0 : index
    %c0_14 = arith.constant 0 : index
    %16 = vector.load %arg8[%c0_13, %c0_14] : memref<1x128xf32, #tpu.memory_space<vmem>>, vector<1x128xf32>
    %17 = vector.broadcast %16 : vector<1x128xf32> to vector<2x128xf32>
    %18 = arith.addf %15, %17 : vector<2x128xf32>
    %c0_15 = arith.constant 0 : index
    %c0_16 = arith.constant 0 : index
    %19 = vector.load %arg6[%c0_15, %c0_16] : memref<32x128xf32, #tpu.memory_space<vmem>>, vector<32x128xf32>
    %cst_17 = arith.constant dense<0.000000e+00> : vector<16x128xf32>
    %20 = tpu.matmul %13, %19, %cst_17 {dimension_numbers = #tpu.dot_dimension_numbers<[1], [0], [0], [1], [0, 0, 1, 1], [], []>} : vector<16x32xf32>, vector<32x128xf32>, vector<16x128xf32> -> vector<16x128xf32>
    %c0_18 = arith.constant 0 : index
    %c0_19 = arith.constant 0 : index
    %21 = vector.load %arg8[%c0_18, %c0_19] : memref<1x128xf32, #tpu.memory_space<vmem>>, vector<1x128xf32>
    %22 = vector.broadcast %21 : vector<1x128xf32> to vector<16x128xf32>
    %23 = arith.addf %20, %22 : vector<16x128xf32>
    %cst_20 = arith.constant 0.000000e+00 : f32
    %24 = vector.broadcast %cst_20 : f32 to vector<2x32xf32>
    %cst_21 = arith.constant 0.000000e+00 : f32
    %25 = vector.broadcast %cst_21 : f32 to vector<2x32xf32>
    %c0_22 = arith.constant 0 : index
    %c0_23 = arith.constant 0 : index
    %26 = vector.load %arg7[%c0_22, %c0_23] : memref<32x128xf32, #tpu.memory_space<vmem>>, vector<32x128xf32>
    %cst_24 = arith.constant dense<0.000000e+00> : vector<2x128xf32>
    %27 = tpu.matmul %24, %26, %cst_24 {dimension_numbers = #tpu.dot_dimension_numbers<[1], [0], [0], [1], [0, 0, 1, 1], [], []>} : vector<2x32xf32>, vector<32x128xf32>, vector<2x128xf32> -> vector<2x128xf32>
    %28 = arith.addf %18, %27 : vector<2x128xf32>
    %29 = vector.extract_strided_slice %28 {offsets = [0, 0], sizes = [2, 32], strides = [1, 1]} : vector<2x128xf32> to vector<2x32xf32>
    %30 = arith.negf %29 : vector<2x32xf32>
    %31 = math.exp %30 : vector<2x32xf32>
    %cst_25 = arith.constant 1.000000e+00 : f32
    %32 = vector.broadcast %cst_25 : f32 to vector<2x32xf32>
    %33 = arith.addf %32, %31 : vector<2x32xf32>
    %34 = arith.divf %32, %33 : vector<2x32xf32>
    %35 = vector.extract_strided_slice %28 {offsets = [0, 32], sizes = [2, 32], strides = [1, 1]} : vector<2x128xf32> to vector<2x32xf32>
    %36 = arith.negf %35 : vector<2x32xf32>
    %37 = math.exp %36 : vector<2x32xf32>
    %cst_26 = arith.constant 1.000000e+00 : f32
    %38 = vector.broadcast %cst_26 : f32 to vector<2x32xf32>
    %39 = arith.addf %38, %37 : vector<2x32xf32>
    %40 = arith.divf %38, %39 : vector<2x32xf32>
    %41 = vector.extract_strided_slice %28 {offsets = [0, 64], sizes = [2, 32], strides = [1, 1]} : vector<2x128xf32> to vector<2x32xf32>
    %42 = math.tanh %41 : vector<2x32xf32>
    %43 = vector.extract_strided_slice %28 {offsets = [0, 96], sizes = [2, 32], strides = [1, 1]} : vector<2x128xf32> to vector<2x32xf32>
    %44 = arith.negf %43 : vector<2x32xf32>
    %45 = math.exp %44 : vector<2x32xf32>
    %cst_27 = arith.constant 1.000000e+00 : f32
    %46 = vector.broadcast %cst_27 : f32 to vector<2x32xf32>
    %47 = arith.addf %46, %45 : vector<2x32xf32>
    %48 = arith.divf %46, %47 : vector<2x32xf32>
    %49 = arith.mulf %40, %25 : vector<2x32xf32>
    %50 = arith.mulf %34, %42 : vector<2x32xf32>
    %51 = arith.addf %49, %50 : vector<2x32xf32>
    %52 = math.tanh %51 : vector<2x32xf32>
    %53 = arith.mulf %48, %52 : vector<2x32xf32>
    %c0_28 = arith.constant 0 : index
    %c0_29 = arith.constant 0 : index
    %54 = vector.load %arg12[%c0_28, %c0_29] : memref<18x32xf32, #tpu.memory_space<vmem>>, vector<2x32xf32>
    tpu.vector_store %arg12[%c0_28, %c0_29], %53 {strides = array<i32>} : memref<18x32xf32, #tpu.memory_space<vmem>>, vector<2x32xf32>,
    %55 = vector.extract_strided_slice %23 {offsets = [0, 0], sizes = [2, 128], strides = [1, 1]} : vector<16x128xf32> to vector<2x128xf32>
    %c0_30 = arith.constant 0 : index
    %c0_31 = arith.constant 0 : index
    %56 = vector.load %arg7[%c0_30, %c0_31] : memref<32x128xf32, #tpu.memory_space<vmem>>, vector<32x128xf32>
    %cst_32 = arith.constant dense<0.000000e+00> : vector<2x128xf32>
    %57 = tpu.matmul %53, %56, %cst_32 {dimension_numbers = #tpu.dot_dimension_numbers<[1], [0], [0], [1], [0, 0, 1, 1], [], []>} : vector<2x32xf32>, vector<32x128xf32>, vector<2x128xf32> -> vector<2x128xf32>
    %58 = arith.addf %55, %57 : vector<2x128xf32>
    %59 = vector.extract_strided_slice %58 {offsets = [0, 0], sizes = [2, 32], strides = [1, 1]} : vector<2x128xf32> to vector<2x32xf32>
    %60 = arith.negf %59 : vector<2x32xf32>
    %61 = math.exp %60 : vector<2x32xf32>
    %cst_33 = arith.constant 1.000000e+00 : f32
    %62 = vector.broadcast %cst_33 : f32 to vector<2x32xf32>
    %63 = arith.addf %62, %61 : vector<2x32xf32>
    %64 = arith.divf %62, %63 : vector<2x32xf32>
    %65 = vector.extract_strided_slice %58 {offsets = [0, 32], sizes = [2, 32], strides = [1, 1]} : vector<2x128xf32> to vector<2x32xf32>
    %66 = arith.negf %65 : vector<2x32xf32>
    %67 = math.exp %66 : vector<2x32xf32>
    %cst_34 = arith.constant 1.000000e+00 : f32
    %68 = vector.broadcast %cst_34 : f32 to vector<2x32xf32>
    %69 = arith.addf %68, %67 : vector<2x32xf32>
    %70 = arith.divf %68, %69 : vector<2x32xf32>
    %71 = vector.extract_strided_slice %58 {offsets = [0, 64], sizes = [2, 32], strides = [1, 1]} : vector<2x128xf32> to vector<2x32xf32>
    %72 = math.tanh %71 : vector<2x32xf32>
    %73 = vector.extract_strided_slice %58 {offsets = [0, 96], sizes = [2, 32], strides = [1, 1]} : vector<2x128xf32> to vector<2x32xf32>
    %74 = arith.negf %73 : vector<2x32xf32>
    %75 = math.exp %74 : vector<2x32xf32>
    %cst_35 = arith.constant 1.000000e+00 : f32
    %76 = vector.broadcast %cst_35 : f32 to vector<2x32xf32>
    %77 = arith.addf %76, %75 : vector<2x32xf32>
    %78 = arith.divf %76, %77 : vector<2x32xf32>
    %79 = arith.mulf %70, %51 : vector<2x32xf32>
    %80 = arith.mulf %64, %72 : vector<2x32xf32>
    %81 = arith.addf %79, %80 : vector<2x32xf32>
    %82 = math.tanh %81 : vector<2x32xf32>
    %83 = arith.mulf %78, %82 : vector<2x32xf32>
    %c2 = arith.constant 2 : index
    %c0_36 = arith.constant 0 : index
    %84 = vector.load %arg12[%c2, %c0_36] : memref<18x32xf32, #tpu.memory_space<vmem>>, vector<2x32xf32>
    tpu.vector_store %arg12[%c2, %c0_36], %83 {strides = array<i32>} : memref<18x32xf32, #tpu.memory_space<vmem>>, vector<2x32xf32>,
    %85 = vector.extract_strided_slice %23 {offsets = [2, 0], sizes = [2, 128], strides = [1, 1]} : vector<16x128xf32> to vector<2x128xf32>
    %c0_37 = arith.constant 0 : index
    %c0_38 = arith.constant 0 : index
    %86 = vector.load %arg7[%c0_37, %c0_38] : memref<32x128xf32, #tpu.memory_space<vmem>>, vector<32x128xf32>
    %cst_39 = arith.constant dense<0.000000e+00> : vector<2x128xf32>
    %87 = tpu.matmul %83, %86, %cst_39 {dimension_numbers = #tpu.dot_dimension_numbers<[1], [0], [0], [1], [0, 0, 1, 1], [], []>} : vector<2x32xf32>, vector<32x128xf32>, vector<2x128xf32> -> vector<2x128xf32>
    %88 = arith.addf %85, %87 : vector<2x128xf32>
    %89 = vector.extract_strided_slice %88 {offsets = [0, 0], sizes = [2, 32], strides = [1, 1]} : vector<2x128xf32> to vector<2x32xf32>
    %90 = arith.negf %89 : vector<2x32xf32>
    %91 = math.exp %90 : vector<2x32xf32>
    %cst_40 = arith.constant 1.000000e+00 : f32
    %92 = vector.broadcast %cst_40 : f32 to vector<2x32xf32>
    %93 = arith.addf %92, %91 : vector<2x32xf32>
    %94 = arith.divf %92, %93 : vector<2x32xf32>
    %95 = vector.extract_strided_slice %88 {offsets = [0, 32], sizes = [2, 32], strides = [1, 1]} : vector<2x128xf32> to vector<2x32xf32>
    %96 = arith.negf %95 : vector<2x32xf32>
    %97 = math.exp %96 : vector<2x32xf32>
    %cst_41 = arith.constant 1.000000e+00 : f32
    %98 = vector.broadcast %cst_41 : f32 to vector<2x32xf32>
    %99 = arith.addf %98, %97 : vector<2x32xf32>
    %100 = arith.divf %98, %99 : vector<2x32xf32>
    %101 = vector.extract_strided_slice %88 {offsets = [0, 64], sizes = [2, 32], strides = [1, 1]} : vector<2x128xf32> to vector<2x32xf32>
    %102 = math.tanh %101 : vector<2x32xf32>
    %103 = vector.extract_strided_slice %88 {offsets = [0, 96], sizes = [2, 32], strides = [1, 1]} : vector<2x128xf32> to vector<2x32xf32>
    %104 = arith.negf %103 : vector<2x32xf32>
    %105 = math.exp %104 : vector<2x32xf32>
    %cst_42 = arith.constant 1.000000e+00 : f32
    %106 = vector.broadcast %cst_42 : f32 to vector<2x32xf32>
    %107 = arith.addf %106, %105 : vector<2x32xf32>
    %108 = arith.divf %106, %107 : vector<2x32xf32>
    %109 = arith.mulf %100, %81 : vector<2x32xf32>
    %110 = arith.mulf %94, %102 : vector<2x32xf32>
    %111 = arith.addf %109, %110 : vector<2x32xf32>
    %112 = math.tanh %111 : vector<2x32xf32>
    %113 = arith.mulf %108, %112 : vector<2x32xf32>
    %c4 = arith.constant 4 : index
    %c0_43 = arith.constant 0 : index
    %114 = vector.load %arg12[%c4, %c0_43] : memref<18x32xf32, #tpu.memory_space<vmem>>, vector<2x32xf32>
    tpu.vector_store %arg12[%c4, %c0_43], %113 {strides = array<i32>} : memref<18x32xf32, #tpu.memory_space<vmem>>, vector<2x32xf32>,
    %115 = vector.extract_strided_slice %23 {offsets = [4, 0], sizes = [2, 128], strides = [1, 1]} : vector<16x128xf32> to vector<2x128xf32>
    %c0_44 = arith.constant 0 : index
    %c0_45 = arith.constant 0 : index
    %116 = vector.load %arg7[%c0_44, %c0_45] : memref<32x128xf32, #tpu.memory_space<vmem>>, vector<32x128xf32>
    %cst_46 = arith.constant dense<0.000000e+00> : vector<2x128xf32>
    %117 = tpu.matmul %113, %116, %cst_46 {dimension_numbers = #tpu.dot_dimension_numbers<[1], [0], [0], [1], [0, 0, 1, 1], [], []>} : vector<2x32xf32>, vector<32x128xf32>, vector<2x128xf32> -> vector<2x128xf32>
    %118 = arith.addf %115, %117 : vector<2x128xf32>
    %119 = vector.extract_strided_slice %118 {offsets = [0, 0], sizes = [2, 32], strides = [1, 1]} : vector<2x128xf32> to vector<2x32xf32>
    %120 = arith.negf %119 : vector<2x32xf32>
    %121 = math.exp %120 : vector<2x32xf32>
    %cst_47 = arith.constant 1.000000e+00 : f32
    %122 = vector.broadcast %cst_47 : f32 to vector<2x32xf32>
    %123 = arith.addf %122, %121 : vector<2x32xf32>
    %124 = arith.divf %122, %123 : vector<2x32xf32>
    %125 = vector.extract_strided_slice %118 {offsets = [0, 32], sizes = [2, 32], strides = [1, 1]} : vector<2x128xf32> to vector<2x32xf32>
    %126 = arith.negf %125 : vector<2x32xf32>
    %127 = math.exp %126 : vector<2x32xf32>
    %cst_48 = arith.constant 1.000000e+00 : f32
    %128 = vector.broadcast %cst_48 : f32 to vector<2x32xf32>
    %129 = arith.addf %128, %127 : vector<2x32xf32>
    %130 = arith.divf %128, %129 : vector<2x32xf32>
    %131 = vector.extract_strided_slice %118 {offsets = [0, 64], sizes = [2, 32], strides = [1, 1]} : vector<2x128xf32> to vector<2x32xf32>
    %132 = math.tanh %131 : vector<2x32xf32>
    %133 = vector.extract_strided_slice %118 {offsets = [0, 96], sizes = [2, 32], strides = [1, 1]} : vector<2x128xf32> to vector<2x32xf32>
    %134 = arith.negf %133 : vector<2x32xf32>
    %135 = math.exp %134 : vector<2x32xf32>
    %cst_49 = arith.constant 1.000000e+00 : f32
    %136 = vector.broadcast %cst_49 : f32 to vector<2x32xf32>
    %137 = arith.addf %136, %135 : vector<2x32xf32>
    %138 = arith.divf %136, %137 : vector<2x32xf32>
    %139 = arith.mulf %130, %111 : vector<2x32xf32>
    %140 = arith.mulf %124, %132 : vector<2x32xf32>
    %141 = arith.addf %139, %140 : vector<2x32xf32>
    %142 = math.tanh %141 : vector<2x32xf32>
    %143 = arith.mulf %138, %142 : vector<2x32xf32>
    %c6 = arith.constant 6 : index
    %c0_50 = arith.constant 0 : index
    %144 = vector.load %arg12[%c6, %c0_50] : memref<18x32xf32, #tpu.memory_space<vmem>>, vector<2x32xf32>
    tpu.vector_store %arg12[%c6, %c0_50], %143 {strides = array<i32>} : memref<18x32xf32, #tpu.memory_space<vmem>>, vector<2x32xf32>,
    %145 = vector.extract_strided_slice %23 {offsets = [6, 0], sizes = [2, 128], strides = [1, 1]} : vector<16x128xf32> to vector<2x128xf32>
    %c0_51 = arith.constant 0 : index
    %c0_52 = arith.constant 0 : index
    %146 = vector.load %arg7[%c0_51, %c0_52] : memref<32x128xf32, #tpu.memory_space<vmem>>, vector<32x128xf32>
    %cst_53 = arith.constant dense<0.000000e+00> : vector<2x128xf32>
    %147 = tpu.matmul %143, %146, %cst_53 {dimension_numbers = #tpu.dot_dimension_numbers<[1], [0], [0], [1], [0, 0, 1, 1], [], []>} : vector<2x32xf32>, vector<32x128xf32>, vector<2x128xf32> -> vector<2x128xf32>
    %148 = arith.addf %145, %147 : vector<2x128xf32>
    %149 = vector.extract_strided_slice %148 {offsets = [0, 0], sizes = [2, 32], strides = [1, 1]} : vector<2x128xf32> to vector<2x32xf32>
    %150 = arith.negf %149 : vector<2x32xf32>
    %151 = math.exp %150 : vector<2x32xf32>
    %cst_54 = arith.constant 1.000000e+00 : f32
    %152 = vector.broadcast %cst_54 : f32 to vector<2x32xf32>
    %153 = arith.addf %152, %151 : vector<2x32xf32>
    %154 = arith.divf %152, %153 : vector<2x32xf32>
    %155 = vector.extract_strided_slice %148 {offsets = [0, 32], sizes = [2, 32], strides = [1, 1]} : vector<2x128xf32> to vector<2x32xf32>
    %156 = arith.negf %155 : vector<2x32xf32>
    %157 = math.exp %156 : vector<2x32xf32>
    %cst_55 = arith.constant 1.000000e+00 : f32
    %158 = vector.broadcast %cst_55 : f32 to vector<2x32xf32>
    %159 = arith.addf %158, %157 : vector<2x32xf32>
    %160 = arith.divf %158, %159 : vector<2x32xf32>
    %161 = vector.extract_strided_slice %148 {offsets = [0, 64], sizes = [2, 32], strides = [1, 1]} : vector<2x128xf32> to vector<2x32xf32>
    %162 = math.tanh %161 : vector<2x32xf32>
    %163 = vector.extract_strided_slice %148 {offsets = [0, 96], sizes = [2, 32], strides = [1, 1]} : vector<2x128xf32> to vector<2x32xf32>
    %164 = arith.negf %163 : vector<2x32xf32>
    %165 = math.exp %164 : vector<2x32xf32>
    %cst_56 = arith.constant 1.000000e+00 : f32
    %166 = vector.broadcast %cst_56 : f32 to vector<2x32xf32>
    %167 = arith.addf %166, %165 : vector<2x32xf32>
    %168 = arith.divf %166, %167 : vector<2x32xf32>
    %169 = arith.mulf %160, %141 : vector<2x32xf32>
    %170 = arith.mulf %154, %162 : vector<2x32xf32>
    %171 = arith.addf %169, %170 : vector<2x32xf32>
    %172 = math.tanh %171 : vector<2x32xf32>
    %173 = arith.mulf %168, %172 : vector<2x32xf32>
    %c8 = arith.constant 8 : index
    %c0_57 = arith.constant 0 : index
    %174 = vector.load %arg12[%c8, %c0_57] : memref<18x32xf32, #tpu.memory_space<vmem>>, vector<2x32xf32>
    tpu.vector_store %arg12[%c8, %c0_57], %173 {strides = array<i32>} : memref<18x32xf32, #tpu.memory_space<vmem>>, vector<2x32xf32>,
    %175 = vector.extract_strided_slice %23 {offsets = [8, 0], sizes = [2, 128], strides = [1, 1]} : vector<16x128xf32> to vector<2x128xf32>
    %c0_58 = arith.constant 0 : index
    %c0_59 = arith.constant 0 : index
    %176 = vector.load %arg7[%c0_58, %c0_59] : memref<32x128xf32, #tpu.memory_space<vmem>>, vector<32x128xf32>
    %cst_60 = arith.constant dense<0.000000e+00> : vector<2x128xf32>
    %177 = tpu.matmul %173, %176, %cst_60 {dimension_numbers = #tpu.dot_dimension_numbers<[1], [0], [0], [1], [0, 0, 1, 1], [], []>} : vector<2x32xf32>, vector<32x128xf32>, vector<2x128xf32> -> vector<2x128xf32>
    %178 = arith.addf %175, %177 : vector<2x128xf32>
    %179 = vector.extract_strided_slice %178 {offsets = [0, 0], sizes = [2, 32], strides = [1, 1]} : vector<2x128xf32> to vector<2x32xf32>
    %180 = arith.negf %179 : vector<2x32xf32>
    %181 = math.exp %180 : vector<2x32xf32>
    %cst_61 = arith.constant 1.000000e+00 : f32
    %182 = vector.broadcast %cst_61 : f32 to vector<2x32xf32>
    %183 = arith.addf %182, %181 : vector<2x32xf32>
    %184 = arith.divf %182, %183 : vector<2x32xf32>
    %185 = vector.extract_strided_slice %178 {offsets = [0, 32], sizes = [2, 32], strides = [1, 1]} : vector<2x128xf32> to vector<2x32xf32>
    %186 = arith.negf %185 : vector<2x32xf32>
    %187 = math.exp %186 : vector<2x32xf32>
    %cst_62 = arith.constant 1.000000e+00 : f32
    %188 = vector.broadcast %cst_62 : f32 to vector<2x32xf32>
    %189 = arith.addf %188, %187 : vector<2x32xf32>
    %190 = arith.divf %188, %189 : vector<2x32xf32>
    %191 = vector.extract_strided_slice %178 {offsets = [0, 64], sizes = [2, 32], strides = [1, 1]} : vector<2x128xf32> to vector<2x32xf32>
    %192 = math.tanh %191 : vector<2x32xf32>
    %193 = vector.extract_strided_slice %178 {offsets = [0, 96], sizes = [2, 32], strides = [1, 1]} : vector<2x128xf32> to vector<2x32xf32>
    %194 = arith.negf %193 : vector<2x32xf32>
    %195 = math.exp %194 : vector<2x32xf32>
    %cst_63 = arith.constant 1.000000e+00 : f32
    %196 = vector.broadcast %cst_63 : f32 to vector<2x32xf32>
    %197 = arith.addf %196, %195 : vector<2x32xf32>
    %198 = arith.divf %196, %197 : vector<2x32xf32>
    %199 = arith.mulf %190, %171 : vector<2x32xf32>
    %200 = arith.mulf %184, %192 : vector<2x32xf32>
    %201 = arith.addf %199, %200 : vector<2x32xf32>
    %202 = math.tanh %201 : vector<2x32xf32>
    %203 = arith.mulf %198, %202 : vector<2x32xf32>
    %c10 = arith.constant 10 : index
    %c0_64 = arith.constant 0 : index
    %204 = vector.load %arg12[%c10, %c0_64] : memref<18x32xf32, #tpu.memory_space<vmem>>, vector<2x32xf32>
    tpu.vector_store %arg12[%c10, %c0_64], %203 {strides = array<i32>} : memref<18x32xf32, #tpu.memory_space<vmem>>, vector<2x32xf32>,
    %205 = vector.extract_strided_slice %23 {offsets = [10, 0], sizes = [2, 128], strides = [1, 1]} : vector<16x128xf32> to vector<2x128xf32>
    %c0_65 = arith.constant 0 : index
    %c0_66 = arith.constant 0 : index
    %206 = vector.load %arg7[%c0_65, %c0_66] : memref<32x128xf32, #tpu.memory_space<vmem>>, vector<32x128xf32>
    %cst_67 = arith.constant dense<0.000000e+00> : vector<2x128xf32>
    %207 = tpu.matmul %203, %206, %cst_67 {dimension_numbers = #tpu.dot_dimension_numbers<[1], [0], [0], [1], [0, 0, 1, 1], [], []>} : vector<2x32xf32>, vector<32x128xf32>, vector<2x128xf32> -> vector<2x128xf32>
    %208 = arith.addf %205, %207 : vector<2x128xf32>
    %209 = vector.extract_strided_slice %208 {offsets = [0, 0], sizes = [2, 32], strides = [1, 1]} : vector<2x128xf32> to vector<2x32xf32>
    %210 = arith.negf %209 : vector<2x32xf32>
    %211 = math.exp %210 : vector<2x32xf32>
    %cst_68 = arith.constant 1.000000e+00 : f32
    %212 = vector.broadcast %cst_68 : f32 to vector<2x32xf32>
    %213 = arith.addf %212, %211 : vector<2x32xf32>
    %214 = arith.divf %212, %213 : vector<2x32xf32>
    %215 = vector.extract_strided_slice %208 {offsets = [0, 32], sizes = [2, 32], strides = [1, 1]} : vector<2x128xf32> to vector<2x32xf32>
    %216 = arith.negf %215 : vector<2x32xf32>
    %217 = math.exp %216 : vector<2x32xf32>
    %cst_69 = arith.constant 1.000000e+00 : f32
    %218 = vector.broadcast %cst_69 : f32 to vector<2x32xf32>
    %219 = arith.addf %218, %217 : vector<2x32xf32>
    %220 = arith.divf %218, %219 : vector<2x32xf32>
    %221 = vector.extract_strided_slice %208 {offsets = [0, 64], sizes = [2, 32], strides = [1, 1]} : vector<2x128xf32> to vector<2x32xf32>
    %222 = math.tanh %221 : vector<2x32xf32>
    %223 = vector.extract_strided_slice %208 {offsets = [0, 96], sizes = [2, 32], strides = [1, 1]} : vector<2x128xf32> to vector<2x32xf32>
    %224 = arith.negf %223 : vector<2x32xf32>
    %225 = math.exp %224 : vector<2x32xf32>
    %cst_70 = arith.constant 1.000000e+00 : f32
    %226 = vector.broadcast %cst_70 : f32 to vector<2x32xf32>
    %227 = arith.addf %226, %225 : vector<2x32xf32>
    %228 = arith.divf %226, %227 : vector<2x32xf32>
    %229 = arith.mulf %220, %201 : vector<2x32xf32>
    %230 = arith.mulf %214, %222 : vector<2x32xf32>
    %231 = arith.addf %229, %230 : vector<2x32xf32>
    %232 = math.tanh %231 : vector<2x32xf32>
    %233 = arith.mulf %228, %232 : vector<2x32xf32>
    %c12 = arith.constant 12 : index
    %c0_71 = arith.constant 0 : index
    %234 = vector.load %arg12[%c12, %c0_71] : memref<18x32xf32, #tpu.memory_space<vmem>>, vector<2x32xf32>
    tpu.vector_store %arg12[%c12, %c0_71], %233 {strides = array<i32>} : memref<18x32xf32, #tpu.memory_space<vmem>>, vector<2x32xf32>,
    %235 = vector.extract_strided_slice %23 {offsets = [12, 0], sizes = [2, 128], strides = [1, 1]} : vector<16x128xf32> to vector<2x128xf32>
    %c0_72 = arith.constant 0 : index
    %c0_73 = arith.constant 0 : index
    %236 = vector.load %arg7[%c0_72, %c0_73] : memref<32x128xf32, #tpu.memory_space<vmem>>, vector<32x128xf32>
    %cst_74 = arith.constant dense<0.000000e+00> : vector<2x128xf32>
    %237 = tpu.matmul %233, %236, %cst_74 {dimension_numbers = #tpu.dot_dimension_numbers<[1], [0], [0], [1], [0, 0, 1, 1], [], []>} : vector<2x32xf32>, vector<32x128xf32>, vector<2x128xf32> -> vector<2x128xf32>
    %238 = arith.addf %235, %237 : vector<2x128xf32>
    %239 = vector.extract_strided_slice %238 {offsets = [0, 0], sizes = [2, 32], strides = [1, 1]} : vector<2x128xf32> to vector<2x32xf32>
    %240 = arith.negf %239 : vector<2x32xf32>
    %241 = math.exp %240 : vector<2x32xf32>
    %cst_75 = arith.constant 1.000000e+00 : f32
    %242 = vector.broadcast %cst_75 : f32 to vector<2x32xf32>
    %243 = arith.addf %242, %241 : vector<2x32xf32>
    %244 = arith.divf %242, %243 : vector<2x32xf32>
    %245 = vector.extract_strided_slice %238 {offsets = [0, 32], sizes = [2, 32], strides = [1, 1]} : vector<2x128xf32> to vector<2x32xf32>
    %246 = arith.negf %245 : vector<2x32xf32>
    %247 = math.exp %246 : vector<2x32xf32>
    %cst_76 = arith.constant 1.000000e+00 : f32
    %248 = vector.broadcast %cst_76 : f32 to vector<2x32xf32>
    %249 = arith.addf %248, %247 : vector<2x32xf32>
    %250 = arith.divf %248, %249 : vector<2x32xf32>
    %251 = vector.extract_strided_slice %238 {offsets = [0, 64], sizes = [2, 32], strides = [1, 1]} : vector<2x128xf32> to vector<2x32xf32>
    %252 = math.tanh %251 : vector<2x32xf32>
    %253 = vector.extract_strided_slice %238 {offsets = [0, 96], sizes = [2, 32], strides = [1, 1]} : vector<2x128xf32> to vector<2x32xf32>
    %254 = arith.negf %253 : vector<2x32xf32>
    %255 = math.exp %254 : vector<2x32xf32>
    %cst_77 = arith.constant 1.000000e+00 : f32
    %256 = vector.broadcast %cst_77 : f32 to vector<2x32xf32>
    %257 = arith.addf %256, %255 : vector<2x32xf32>
    %258 = arith.divf %256, %257 : vector<2x32xf32>
    %259 = arith.mulf %250, %231 : vector<2x32xf32>
    %260 = arith.mulf %244, %252 : vector<2x32xf32>
    %261 = arith.addf %259, %260 : vector<2x32xf32>
    %262 = math.tanh %261 : vector<2x32xf32>
    %263 = arith.mulf %258, %262 : vector<2x32xf32>
    %c14 = arith.constant 14 : index
    %c0_78 = arith.constant 0 : index
    %264 = vector.load %arg12[%c14, %c0_78] : memref<18x32xf32, #tpu.memory_space<vmem>>, vector<2x32xf32>
    tpu.vector_store %arg12[%c14, %c0_78], %263 {strides = array<i32>} : memref<18x32xf32, #tpu.memory_space<vmem>>, vector<2x32xf32>,
    %265 = vector.extract_strided_slice %23 {offsets = [14, 0], sizes = [2, 128], strides = [1, 1]} : vector<16x128xf32> to vector<2x128xf32>
    %c0_79 = arith.constant 0 : index
    %c0_80 = arith.constant 0 : index
    %266 = vector.load %arg7[%c0_79, %c0_80] : memref<32x128xf32, #tpu.memory_space<vmem>>, vector<32x128xf32>
    %cst_81 = arith.constant dense<0.000000e+00> : vector<2x128xf32>
    %267 = tpu.matmul %263, %266, %cst_81 {dimension_numbers = #tpu.dot_dimension_numbers<[1], [0], [0], [1], [0, 0, 1, 1], [], []>} : vector<2x32xf32>, vector<32x128xf32>, vector<2x128xf32> -> vector<2x128xf32>
    %268 = arith.addf %265, %267 : vector<2x128xf32>
    %269 = vector.extract_strided_slice %268 {offsets = [0, 0], sizes = [2, 32], strides = [1, 1]} : vector<2x128xf32> to vector<2x32xf32>
    %270 = arith.negf %269 : vector<2x32xf32>
    %271 = math.exp %270 : vector<2x32xf32>
    %cst_82 = arith.constant 1.000000e+00 : f32
    %272 = vector.broadcast %cst_82 : f32 to vector<2x32xf32>
    %273 = arith.addf %272, %271 : vector<2x32xf32>
    %274 = arith.divf %272, %273 : vector<2x32xf32>
    %275 = vector.extract_strided_slice %268 {offsets = [0, 32], sizes = [2, 32], strides = [1, 1]} : vector<2x128xf32> to vector<2x32xf32>
    %276 = arith.negf %275 : vector<2x32xf32>
    %277 = math.exp %276 : vector<2x32xf32>
    %cst_83 = arith.constant 1.000000e+00 : f32
    %278 = vector.broadcast %cst_83 : f32 to vector<2x32xf32>
    %279 = arith.addf %278, %277 : vector<2x32xf32>
    %280 = arith.divf %278, %279 : vector<2x32xf32>
    %281 = vector.extract_strided_slice %268 {offsets = [0, 64], sizes = [2, 32], strides = [1, 1]} : vector<2x128xf32> to vector<2x32xf32>
    %282 = math.tanh %281 : vector<2x32xf32>
    %283 = vector.extract_strided_slice %268 {offsets = [0, 96], sizes = [2, 32], strides = [1, 1]} : vector<2x128xf32> to vector<2x32xf32>
    %284 = arith.negf %283 : vector<2x32xf32>
    %285 = math.exp %284 : vector<2x32xf32>
    %cst_84 = arith.constant 1.000000e+00 : f32
    %286 = vector.broadcast %cst_84 : f32 to vector<2x32xf32>
    %287 = arith.addf %286, %285 : vector<2x32xf32>
    %288 = arith.divf %286, %287 : vector<2x32xf32>
    %289 = arith.mulf %280, %261 : vector<2x32xf32>
    %290 = arith.mulf %274, %282 : vector<2x32xf32>
    %291 = arith.addf %289, %290 : vector<2x32xf32>
    %292 = math.tanh %291 : vector<2x32xf32>
    %293 = arith.mulf %288, %292 : vector<2x32xf32>
    %c16 = arith.constant 16 : index
    %c0_85 = arith.constant 0 : index
    %294 = vector.load %arg12[%c16, %c0_85] : memref<18x32xf32, #tpu.memory_space<vmem>>, vector<2x32xf32>
    tpu.vector_store %arg12[%c16, %c0_85], %293 {strides = array<i32>} : memref<18x32xf32, #tpu.memory_space<vmem>>, vector<2x32xf32>,
    %c0_86 = arith.constant 0 : index
    %c0_87 = arith.constant 0 : index
    %295 = vector.load %arg12[%c0_86, %c0_87] : memref<18x32xf32, #tpu.memory_space<vmem>>, vector<18x32xf32>
    %c0_88 = arith.constant 0 : index
    %c0_89 = arith.constant 0 : index
    %296 = vector.load %arg9[%c0_88, %c0_89] : memref<32x128xf32, #tpu.memory_space<vmem>>, vector<32x128xf32>
    %cst_90 = arith.constant dense<0.000000e+00> : vector<18x128xf32>
    %297 = tpu.matmul %295, %296, %cst_90 {dimension_numbers = #tpu.dot_dimension_numbers<[1], [0], [0], [1], [0, 0, 1, 1], [], []>} : vector<18x32xf32>, vector<32x128xf32>, vector<18x128xf32> -> vector<18x128xf32>
    %c0_91 = arith.constant 0 : index
    %c0_92 = arith.constant 0 : index
    %298 = vector.load %arg10[%c0_91, %c0_92] : memref<1x128xf32, #tpu.memory_space<vmem>>, vector<1x128xf32>
    %299 = vector.broadcast %298 : vector<1x128xf32> to vector<18x128xf32>
    %300 = arith.addf %297, %299 : vector<18x128xf32>
    %c0_93 = arith.constant 0 : index
    %c0_94 = arith.constant 0 : index
    %301 = vector.load %arg11[%c0_93, %c0_94] : memref<18x128xf32, #tpu.memory_space<vmem>>, vector<18x128xf32>
    tpu.vector_store %arg11[%c0_93, %c0_94], %300 {strides = array<i32>} : memref<18x128xf32, #tpu.memory_space<vmem>>, vector<18x128xf32>,
    return
  }
  func.func @transform_0(%arg0: i32) -> (i32, i32) {
    %c0_i32 = arith.constant 0 : i32
    %c0_i32_0 = arith.constant 0 : i32
    %c0_i32_1 = arith.constant 0 : i32
    return %c0_i32, %c0_i32_0 : i32, i32
  }
  func.func @transform_1(%arg0: i32) -> (i32, i32) {
    %c0_i32 = arith.constant 0 : i32
    %c0_i32_0 = arith.constant 0 : i32
    %c0_i32_1 = arith.constant 0 : i32
    return %c0_i32, %c0_i32_0 : i32, i32
  }
  func.func @transform_2(%arg0: i32) -> (i32, i32) {
    %c0_i32 = arith.constant 0 : i32
    %c0_i32_0 = arith.constant 0 : i32
    %c0_i32_1 = arith.constant 0 : i32
    return %c0_i32, %c0_i32_0 : i32, i32
  }
  func.func @transform_3(%arg0: i32) -> (i32, i32) {
    %c0_i32 = arith.constant 0 : i32
    %c0_i32_0 = arith.constant 0 : i32
    %c0_i32_1 = arith.constant 0 : i32
    return %c0_i32, %c0_i32_0 : i32, i32
  }
  func.func @transform_4(%arg0: i32) -> (i32, i32) {
    %c0_i32 = arith.constant 0 : i32
    %c0_i32_0 = arith.constant 0 : i32
    %c0_i32_1 = arith.constant 0 : i32
    return %c0_i32, %c0_i32_0 : i32, i32
  }
  func.func @transform_5(%arg0: i32) -> (i32, i32) {
    %c0_i32 = arith.constant 0 : i32
    %c0_i32_0 = arith.constant 0 : i32
    %c0_i32_1 = arith.constant 0 : i32
    return %c0_i32, %c0_i32_0 : i32, i32
  }
  func.func @transform_6(%arg0: i32) -> (i32, i32) {
    %c0_i32 = arith.constant 0 : i32
    %c0_i32_0 = arith.constant 0 : i32
    %c0_i32_1 = arith.constant 0 : i32
    return %c0_i32, %c0_i32_0 : i32, i32
  }
  func.func @transform_7(%arg0: i32) -> (i32, i32) {
    %c0_i32 = arith.constant 0 : i32
    %c0_i32_0 = arith.constant 0 : i32
    %c0_i32_1 = arith.constant 0 : i32
    return %c0_i32, %c0_i32_0 : i32, i32
  }
  func.func @transform_8(%arg0: i32) -> (i32, i32) {
    %c0_i32 = arith.constant 0 : i32
    %c0_i32_0 = arith.constant 0 : i32
    %c0_i32_1 = arith.constant 0 : i32
    return %c0_i32, %c0_i32_0 : i32, i32
  }
  func.func @transform_9(%arg0: i32) -> (i32, i32) {
    %c0_i32 = arith.constant 0 : i32
    %c0_i32_0 = arith.constant 0 : i32
    %c0_i32_1 = arith.constant 0 : i32
    return %c0_i32, %c0_i32_0 : i32, i32
  }
  func.func @transform_10(%arg0: i32) -> (i32, i32) {
    %c0_i32 = arith.constant 0 : i32
    %c0_i32_0 = arith.constant 0 : i32
    %c0_i32_1 = arith.constant 0 : i32
    return %c0_i32, %c0_i32_0 : i32, i32
  }
}

</mosaic_0001>

<bundles_post_ra>
// kernel: tpu_custom_call.1
= control target key start
LH: loop header
LB: loop body
LE: loop exit
PB: predicated region body
PF: predicated region fallthrough
CT: control target
= control target key end

     0   :  { %v2022_v2 = vmov 0   ;;  %v2023_v3 = vmov 0.0|0.0   ;;  %vm2024_vm0 = vmmov 0   ;;  %v2025_v10 = vmov 0.0   ;;  %s2362_s0 = inlined_call_operand.vmem [shape: s32[16,1], index: 0, kind: input, shape index: {}]   ;;  %s2363_s1 = inlined_call_operand.vmem [shape: f32[2,48], index: 1, kind: input, shape index: {}]   ;;  %s2364_s2 = inlined_call_operand.vmem [shape: f32[48,32], index: 2, kind: input, shape index: {}]   ;;  %s2365_s3 = inlined_call_operand.vmem [shape: f32[1,32], index: 3, kind: input, shape index: {}]   ;;  %s2366_s4 = inlined_call_operand.vmem [shape: f32[64,32], index: 4, kind: input, shape index: {}]   ;;  %s2367_s5 = inlined_call_operand.vmem [shape: f32[32,128], index: 5, kind: input, shape index: {}]   ;;  %s2368_s6 = inlined_call_operand.vmem [shape: f32[32,128], index: 6, kind: input, shape index: {}]   ;;  %s2369_s7 = inlined_call_operand.vmem [shape: f32[1,128], index: 7, kind: input, shape index: {}]   ;;  %s2370_s8 = inlined_call_operand.vmem [shape: f32[32,128], index: 8, kind: input, shape index: {}]   ;;  %s2371_s9 = inlined_call_operand.vmem [shape: f32[1,128], index: 9, kind: input, shape index: {}]   ;;  %s2372_s10 = inlined_call_operand.hbm [shape: f32[18,128], index: 10, kind: output, shape index: {}]  }
   0x1   :  { %v124_v0 = vld [vmem:[%s2362_s0] sm:$0xff]  ;;  %1925 = vset.pattern.permute.xlu0 %v2022_v2  ;;  %1814 = vmatprep.subr.bf16.mxu0 %v2023_v3  ;;  %v38_v4 = vld [vmem:[%s2364_s2 + $0x8] sm:$0xff]  ;;  %v39_v5 = vld [vmem:[%s2364_s2 + $0x10] sm:$0xff] }
   0x2   :  { %v37_v1 = vld [vmem:[%s2364_s2] sm:$0xff]  ;;  %v40_v6 = vld [vmem:[%s2364_s2 + $0x18] sm:$0xff]  ;;  %129 = vperm.xlu0 %1925, %v124_v0   ;;  %v141_v9 = vld [vmem:[%s2366_s4 + $0x8] sm:$0xff]  ;;  %1654 = vmatprep.mubr.msk.f32.mxu0 %vm2024_vm0, %v2025_v10 }
   0x3   :  { %v1815_v7 = vpack.c.bf16 %v38_v4, %v37_v1  ;;  %v140_v8 = vld [vmem:[%s2366_s4] sm:$0xff]  ;;  %v125_v11 = vld [vmem:[%s2362_s0 + $0x8] sm:$0xff]  ;;  %v142_v13 = vld [vmem:[%s2366_s4 + $0x10] sm:$0xff]  ;;  %v1818_v15 = vpack.c.bf16 %v40_v6, %v39_v5 }
   0x4   :  { %v1823_v12 = vpack.c.bf16 %v141_v9, %v140_v8  ;;  %v143_v14 = vld [vmem:[%s2366_s4 + $0x18] sm:$0xff]  ;;  %v144_v17 = vld [vmem:[%s2366_s4 + $0x20] sm:$0xff]  ;;  %v145_v18 = vld [vmem:[%s2366_s4 + $0x28] sm:$0xff] }
   0x5   :  { %1816 = vmatpush3.bf16.msra.mxu0 %v1815_v7  ;;  %v1827_v16 = vpack.c.bf16 %v143_v14, %v142_v13  ;;  %v41_v19 = vld [vmem:[%s2364_s2 + $0x20] sm:$0xff]  ;;  %v42_v20 = vld [vmem:[%s2364_s2 + $0x28] sm:$0xff] }
   0x6   :  { %1817 = vmatprep.subr.bf16.mxu0 %v2023_v3  ;;  %1824 = vmatprep.subr.bf16.mxu1 %v1823_v12 }
   0x7   :  { %15 = vsyncpa [#allocation4], 0  ;;  %132 = vperm.xlu0 %1925, %v125_v11   ;;  %1826 = vmatpush3.bf16.msra.mxu1 %v1823_v12  ;;  %v1831_v21 = vpack.c.bf16 %v145_v18, %v144_v17  ;;  %v1821_v22 = vpack.c.bf16 %v42_v20, %v41_v19  ;;  %v146_v23 = vld [vmem:[%s2366_s4 + $0x30] sm:$0xff]  ;;  %v147_v24 = vld [vmem:[%s2366_s4 + $0x38] sm:$0xff]  ;;  %vm50_vm1 = vcmask 392192   ;;  %v126_v33 = vlaneseq  ;;  %s2026_s19 = smov 64  }
   0x8   :  { %1828 = vmatprep.subr.bf16.mxu1 %v1827_v16  ;;  %v230_v25 = vld [vmem:[%s2367_s5] sm:$0xff]  ;;  %v231_v26 = vld [vmem:[%s2367_s5 + $0x8] sm:$0xff]  ;;  %v1835_v27 = vpack.c.bf16 %v147_v24, %v146_v23  ;;  %v232_v30 = vld [vmem:[%s2367_s5 + $0x10] sm:$0xff]  ;;  %vm148_vm2 = vcmask 523264   ;;  %vm241_vm5 = vcmask 261120   ;;  %vm502_vm6 = vcmask 254976  }
   0x9   :  { %1819 = vmatpush3.bf16.msra.mxu0 %v1818_v15  ;;  %v36_v28 = vld [vmem:[%s2363_s1] sm:$0x3]  ;;  %v1840_v29 = vpack.c.bf16 %v231_v26, %v230_v25  ;;  %v233_v31 = vld [vmem:[%s2367_s5 + $0x18] sm:$0xff]  ;;  %v127_v34 = vand.u32 127, %v126_v33  ;;  %v397_v40 = vld [vmem:[%s2368_s6 + $0x8] sm:$0xff]  ;;  %vm721_vm7 = vcmask 257026  }
   0xa   :  { %1820 = vmatprep.subr.bf16.mxu0 %v2023_v3  ;;  %v1843_v32 = vpack.c.bf16 %v233_v31, %v232_v30  ;;  %v396_v39 = vld [vmem:[%s2368_s6] sm:$0xff]  ;;  %v398_v43 = vld [vmem:[%s2368_s6 + $0x10] sm:$0xff]  ;;  %v399_v44 = vld [vmem:[%s2368_s6 + $0x18] sm:$0xff]  ;;  %vm953_vm8 = vcmask 261126   ;;  %vm837_vm9 = vcmask 259076   ;;  %s2028_s28 = smov [#allocation3]  }
   0xb   :  { %1830 = vmatpush3.bf16.msra.mxu1 %v1827_v16  ;;  %v2169_v41 = vpack.c.bf16 %v397_v40, %v396_v39  ;;  %v1531_v42 = vld [vmem:[%s2365_s3] ss:$0 sm:$0xff]  ;;  %v2182_v45 = vpack.c.bf16 %v399_v44, %v398_v43  ;;  %s1520_s4 = sshll.u32 %s2028_s28, 4  ;;  %s1521_s4 = int_to_ptr.vmem [resolvable:$true] %s1520_s4 }
   0xc   :  { %1832 = vmatprep.subr.bf16.mxu1 %v1831_v21  ;;  %v1537_v51 = vld [vmem:[%s2369_s7] ss:$0 sm:$0xff]  ;;  %s2027_s7 = smov 32   ;;  %s1998_s29 = scalar_lea.vmem %s1521_s4, 384 }
   0xd   :  { %1822 = vmatpush3.bf16.msra.mxu0 %v1821_v22  ;;  %p1999_p0 = scmp.ne.s32.totalorder %s1521_s4, %s1998_s29  ;;  %p2003_p1 = scmp.lt.s32.totalorder %s1521_s4, %s1521_s4 }
   0xe   :  { %1839 = vmatprep.subr.bf16.mxu0 %v2023_v3  ;;  %p2004_p2 = scmp.lt.s32.totalorder %s1998_s29, %s1998_s29 }
   0xf   :  { %1834 = vmatpush3.bf16.msra.mxu1 %v1831_v21 }
  0x10   :  { %1655 = vmatmul.mubr.msk.f32.vlgmr.msra.gmra.mrb[0].mxu0 %vm50_vm1, %v36_v28  ;;  %1836 = vmatprep.subr.bf16.mxu1 %v1835_v27  ;;  %p2005_p3 = por %p2004_p2, %p2003_p1 }
  0x11   :  { %1841 = vmatpush3.bf16.msra.mxu0 %v1840_v29  ;;  %1684 = vmatprep.mubr.msk.f32.mxu0 %vm2024_vm0, %v2025_v10 }
  0x12   :  { %1842 = vmatprep.subr.bf16.mxu0 %v2023_v3  ;;  %p2006_p4 = pnand %p2005_p3, %p1999_p0 }
  0x13   :  { %1838 = vmatpush3.bf16.msra.mxu1 %v1835_v27 }
  0x14   :  { %1859 = vmatprep.subr.bf16.mxu1 %v2023_v3 }
  0x15   :  { %1844 = vmatpush3.bf16.msra.mxu0 %v1843_v32 }
  0x16   :  { %1846 = vmatprep.subr.bf16.mxu0 %v1840_v29 }
  0x81   :  { %v130_v35 = vpop.permute.xlu0 %129 }
  0x82   :  { %vm134_vm3 = vcmp.eq.s32.totalorder %v130_v35, %v127_v34 }
  0x83   :  { %v1533_v36 = vsel %vm134_vm3, 1.0, %v2025_v10 }
  0x84   :  { %1673 = vmatprep.mubr.msk.f32.mxu1 %vm148_vm2, %v1533_v36 }
  0x86   :  { %v133_v37 = vpop.permute.xlu0 %132 }
  0x87   :  { %vm135_vm4 = vcmp.eq.s32.totalorder %v133_v37, %v127_v34 }
  0x88   :  { %v1534_v38 = vsel %vm135_vm4, 1.0, %v2025_v10 }
  0x89   :  { %1674 = vmatmul.mubr.msk.f32.vlgmr.msra.gmra.mrb[0].mxu1 %vm148_vm2, %v1534_v38 }
  0x8a   :  { %1717 = vmatprep.mubr.msk.f32.mxu1 %vm2024_vm0, %v2025_v10  ;;  %1861 = vmatpush3.bf16.msra.mxu1 %v2169_v41 }
  0x8b   :  { %1862 = vmatprep.subr.bf16.mxu1 %v2023_v3 }
  0x8e   :  { %1864 = vmatpush3.bf16.msra.mxu1 %v2182_v45 }
  0x8f   :  { %1871 = vmatprep.subr.bf16.mxu1 %v2023_v3 }
  0xe3   :  { %v120_v46 = vpop.f32.mrb[0].mxu0 }
  0xe4   :  { %v121_v47 = vadd.f32 %v1531_v42, %v120_v46  ;;  %v1656_v48 = vpop.f32.mrb[1].mxu0 }
  0xe6   :  { %1685 = vmatmul.mubr.msk.f32.vlgmr.msra.gmra.mrb[2].mxu0 %vm241_vm5, %v121_v47 }
  0xe7   :  { %1848 = vmatpush3.bf16.msra.mxu0 %v1840_v29 }
  0xe8   :  { %1850 = vmatprep.subr.bf16.mxu0 %v1843_v32 }
  0xeb   :  { %1852 = vmatpush3.bf16.msra.mxu0 %v1843_v32 }
  0xec   :  { %1853 = vmatprep.subr.bf16.mxu0 %v2023_v3 }
 0x15c   :  { %v1675_v49 = vpop.f32.mrb[0].mxu1 }
 0x15d   :  { %v221_v50 = vpop.f32.mrb[1].mxu1 }
 0x15e   :  { %1695 = vmatprep.mubr.msk.f32.mxu0 %vm241_vm5, %v221_v50 }
 0x15f   :  { %1696 = vmatmul.mubr.msk.f32.vlgmr.msra.gmra.mrb[4].mxu0 %vm241_vm5, %v1675_v49 }
 0x160   :  { %1855 = vmatpush3.bf16.msra.mxu0 %v2169_v41  ;;  %1706 = vmatprep.mubr.msk.f32.mxu0 %vm2024_vm0, %v2025_v10 }
 0x161   :  { %1856 = vmatprep.subr.bf16.mxu0 %v2023_v3 }
 0x164   :  { %1858 = vmatpush3.bf16.msra.mxu0 %v2182_v45 }
 0x165   :  { %1865 = vmatprep.subr.bf16.mxu0 %v2023_v3 }
 0x167   :  { %1707 = vmatmul.mubr.f32.vlgmr.msra.gmra.mrb[2].mxu0 %v2025_v10 }
 0x168   :  { %1867 = vmatpush3.bf16.msra.mxu0 %v2169_v41  ;;  %1728 = vmatprep.mubr.msk.f32.mxu0 %vm2024_vm0, %v2025_v10 }
 0x169   :  { %1868 = vmatprep.subr.bf16.mxu0 %v2023_v3 }
 0x16c   :  { %1870 = vmatpush3.bf16.msra.mxu0 %v2182_v45 }
 0x16d   :  { %1877 = vmatprep.subr.bf16.mxu0 %v2023_v3 }
 0x232   :  { %v1697_v52 = vpop.f32.mrb[4].mxu0 }
 0x233   :  { %v2206_v53 = vadd.f32 %v1697_v52, %v1537_v51  ;;  %v387_v54 = vpop.f32.mrb[5].mxu0 }
 0x234   :  { %v2208_v55 = vadd.f32 %v1537_v51, %v387_v54 }
 0x23a   :  { %v469_v56 = vpop.f32.mrb[2].mxu0 }
 0x23b   :  { %v1913_v57 = vadd.f32 %v1537_v51, %v469_v56  ;;  %v1708_v58 = vpop.f32.mrb[3].mxu0 }
 0x23d   :  { %1926 = vtanh.f32 %v1913_v57  ;;  %v1541_v60 = vmul.f32 -1.442695, %v1913_v57 }
 0x23f   :  { %1928 = vpow2.f32 %v1541_v60 }
 0x247   :  { %v1927_v59 = vpop.eup %1926 }
 0x248   :  { %483 = vrot.lane.b32.xlu1 %v1927_v59, %s2026_s19 }
 0x249   :  { %v1929_v61 = vpop.eup %1928 }
 0x24a   :  { %v477_v62 = vadd.f32 1.0, %v1929_v61 }
 0x24c   :  { %1930 = vrcp.f32 %v477_v62 }
 0x256   :  { %v1931_v63 = vpop.eup %1930 }
 0x257   :  { %v481_v2 = vmul.f32 0.0, %v1931_v63 }
 0x2ba   :  { %v484_v0 = vpop.permute.xlu1 %483 }
 0x2bb   :  { %v486_v1 = vmul.f32 %v1931_v63, %v484_v0 }
 0x2bd   :  { %488 = vrot.lane.b32.xlu1 %v486_v1, %s2027_s7 }
 0x32f   :  { %v489_v4 = vpop.permute.xlu1 %488 }
 0x330   :  { %v491_v5 = vadd.f32 %v489_v4, %v481_v2 }
 0x332   :  { %1932 = vtanh.f32 %v491_v5 }
 0x33c   :  { %v1933_v6 = vpop.eup %1932 }
 0x33d   :  { %494 = vrot.lane.b32.xlu0 %v1933_v6, %s2026_s19 }
 0x3af   :  { %v495_v7 = vpop.permute.xlu0 %494 }
 0x3b0   :  { %v497_v8 = vmul.f32 %v1931_v63, %v495_v7 }
 0x3b2   :  { %499 = vrot.lane.b32.xlu1 %v497_v8, %s2027_s7 }
 0x424   :  { %v500_v9 = vpop.permute.xlu1 %499 }
 0x425   :  { %503 = vst.msk [vmem:[#allocation2] sm:$0x3] %vm502_vm6, %v500_v9  ;;  %1718 = vmatmul.mubr.msk.f32.vlgmr.msra.gmra.mrb[2].mxu1 %vm241_vm5, %v500_v9 }
 0x426   :  { %1873 = vmatpush3.bf16.msra.mxu1 %v2169_v41  ;;  %1739 = vmatprep.mubr.msk.f32.mxu1 %vm2024_vm0, %v2025_v10 }
 0x427   :  { %1874 = vmatprep.subr.bf16.mxu1 %v2023_v3 }
 0x42a   :  { %1876 = vmatpush3.bf16.msra.mxu1 %v2182_v45 }
 0x42b   :  { %1883 = vmatprep.subr.bf16.mxu1 %v2023_v3 }
 0x4f8   :  { %v576_v11 = vpop.f32.mrb[2].mxu1 }
 0x4f9   :  { %v580_v12 = vadd.f32 %v576_v11, %v2208_v55  ;;  %v1719_v13 = vpop.f32.mrb[3].mxu1 }
 0x4fb   :  { %1934 = vtanh.f32 %v580_v12  ;;  %v1543_v15 = vmul.f32 -1.442695, %v580_v12 }
 0x4fd   :  { %1936 = vpow2.f32 %v1543_v15 }
 0x505   :  { %v1935_v14 = vpop.eup %1934 }
 0x506   :  { %590 = vrot.lane.b32.xlu0 %v1935_v14, %s2026_s19 }
 0x507   :  { %v1937_v16 = vpop.eup %1936 }
 0x508   :  { %v584_v17 = vadd.f32 1.0, %v1937_v16 }
 0x50a   :  { %1938 = vrcp.f32 %v584_v17 }
 0x514   :  { %v1939_v18 = vpop.eup %1938 }
 0x515   :  { %v588_v21 = vmul.f32 %v1939_v18, %v491_v5 }
 0x578   :  { %v591_v19 = vpop.permute.xlu0 %590 }
 0x579   :  { %v593_v20 = vmul.f32 %v1939_v18, %v591_v19 }
 0x57b   :  { %595 = vrot.lane.b32.xlu1 %v593_v20, %s2027_s7 }
 0x5ed   :  { %v596_v22 = vpop.permute.xlu1 %595 }
 0x5ee   :  { %v598_v23 = vadd.f32 %v596_v22, %v588_v21 }
 0x5f0   :  { %1940 = vtanh.f32 %v598_v23  ;;  %v698_v39 = vrot.slane %v598_v23, 6 }
 0x5fa   :  { %v1941_v24 = vpop.eup %1940 }
 0x5fb   :  { %601 = vrot.lane.b32.xlu0 %v1941_v24, %s2026_s19 }
 0x66d   :  { %v602_v25 = vpop.permute.xlu0 %601 }
 0x66e   :  { %v604_v26 = vmul.f32 %v1939_v18, %v602_v25 }
 0x670   :  { %606 = vrot.lane.b32.xlu1 %v604_v26, %s2027_s7 }
 0x6e2   :  { %v607_v27 = vpop.permute.xlu1 %606 }
 0x6e3   :  { %609 = vst.msk [vmem:[#allocation2 + $0x2] sm:$0x3] %vm502_vm6, %v607_v27  ;;  %1729 = vmatmul.mubr.msk.f32.vlgmr.msra.gmra.mrb[6].mxu0 %vm241_vm5, %v607_v27 }
 0x6e4   :  { %1879 = vmatpush3.bf16.msra.mxu0 %v2169_v41  ;;  %1750 = vmatprep.mubr.msk.f32.mxu0 %vm2024_vm0, %v2025_v10 }
 0x6e5   :  { %1880 = vmatprep.subr.bf16.mxu0 %v2023_v3 }
 0x6e8   :  { %1882 = vmatpush3.bf16.msra.mxu0 %v2182_v45 }
 0x6e9   :  { %1889 = vmatprep.subr.bf16.mxu0 %v2023_v3 }
 0x7b6   :  { %v682_v28 = vpop.f32.mrb[6].mxu0 }
 0x7b7   :  { %v687_v29 = vrot.slane %v682_v28, 6  ;;  %v1730_v30 = vpop.f32.mrb[7].mxu0 }
 0x7b9   :  { %v689_v31 = vadd.f32 %v687_v29, %v2208_v55 }
 0x7bb   :  { %1942 = vtanh.f32 %v689_v31  ;;  %v1545_v33 = vmul.f32 -1.442695, %v689_v31 }
 0x7bd   :  { %1944 = vpow2.f32 %v1545_v33 }
 0x7c5   :  { %v1943_v32 = vpop.eup %1942 }
 0x7c6   :  { %702 = vrot.lane.b32.xlu0 %v1943_v32, %s2026_s19 }
 0x7c7   :  { %v1945_v34 = vpop.eup %1944 }
 0x7c8   :  { %v693_v35 = vadd.f32 1.0, %v1945_v34 }
 0x7ca   :  { %1946 = vrcp.f32 %v693_v35 }
 0x7d4   :  { %v1947_v36 = vpop.eup %1946 }
 0x7d5   :  { %v700_v40 = vmul.f32 %v1947_v36, %v698_v39 }
 0x838   :  { %v703_v37 = vpop.permute.xlu0 %702 }
 0x839   :  { %v705_v38 = vmul.f32 %v1947_v36, %v703_v37 }
 0x83b   :  { %707 = vrot.lane.b32.xlu1 %v705_v38, %s2027_s7 }
 0x8ad   :  { %v708_v42 = vpop.permute.xlu1 %707 }
 0x8ae   :  { %v710_v43 = vadd.f32 %v708_v42, %v700_v40 }
 0x8b0   :  { %1948 = vtanh.f32 %v710_v43  ;;  %v814_v63 = vrot.slane %v710_v43, 6 }
 0x8ba   :  { %v1949_v44 = vpop.eup %1948 }
 0x8bb   :  { %713 = vrot.lane.b32.xlu0 %v1949_v44, %s2026_s19 }
 0x92d   :  { %v714_v46 = vpop.permute.xlu0 %713 }
 0x92e   :  { %v2239_v47 = vmul.f32 %v1947_v36, %v714_v46 }
 0x930   :  { %v727_v48 = vrot.slane %v2239_v47, 2 }
 0x932   :  { %728 = vrot.lane.b32.xlu1 %v727_v48, %s2027_s7 }
 0x9a4   :  { %v729_v49 = vpop.permute.xlu1 %728 }
 0x9a5   :  { %1740 = vmatmul.mubr.msk.f32.vlgmr.msra.gmra.mrb[4].mxu1 %vm241_vm5, %v729_v49 }
 0x9a6   :  { %1885 = vmatpush3.bf16.msra.mxu1 %v2169_v41  ;;  %1761 = vmatprep.mubr.msk.f32.mxu1 %vm2024_vm0, %v2025_v10 }
 0x9a7   :  { %1886 = vmatprep.subr.bf16.mxu1 %v2023_v3 }
 0x9aa   :  { %1888 = vmatpush3.bf16.msra.mxu1 %v2182_v45 }
 0x9ab   :  { %1895 = vmatprep.subr.bf16.mxu1 %v2023_v3 }
 0xa78   :  { %v798_v50 = vpop.f32.mrb[4].mxu1 }
 0xa79   :  { %v803_v51 = vrot.slane %v798_v50, 4  ;;  %v1741_v52 = vpop.f32.mrb[5].mxu1 }
 0xa7b   :  { %v805_v54 = vadd.f32 %v803_v51, %v2208_v55 }
 0xa7d   :  { %1950 = vtanh.f32 %v805_v54  ;;  %v1547_v57 = vmul.f32 -1.442695, %v805_v54 }
 0xa7f   :  { %1952 = vpow2.f32 %v1547_v57 }
 0xa87   :  { %v1951_v56 = vpop.eup %1950 }
 0xa88   :  { %818 = vrot.lane.b32.xlu0 %v1951_v56, %s2026_s19 }
 0xa89   :  { %v1953_v58 = vpop.eup %1952 }
 0xa8a   :  { %v809_v59 = vadd.f32 1.0, %v1953_v58 }
 0xa8c   :  { %1954 = vrcp.f32 %v809_v59 }
 0xa96   :  { %v1955_v60 = vpop.eup %1954 }
 0xa97   :  { %v816_v0 = vmul.f32 %v1955_v60, %v814_v63 }
 0xafa   :  { %v819_v61 = vpop.permute.xlu0 %818 }
 0xafb   :  { %v821_v62 = vmul.f32 %v1955_v60, %v819_v61 }
 0xafd   :  { %823 = vrot.lane.b32.xlu1 %v821_v62, %s2027_s7 }
 0xb6f   :  { %v824_v1 = vpop.permute.xlu1 %823 }
 0xb70   :  { %v826_v2 = vadd.f32 %v824_v1, %v816_v0 }
 0xb72   :  { %1956 = vtanh.f32 %v826_v2  ;;  %v930_v21 = vrot.slane %v826_v2, 6 }
 0xb7c   :  { %v1957_v4 = vpop.eup %1956 }
 0xb7d   :  { %829 = vrot.lane.b32.xlu0 %v1957_v4, %s2026_s19 }
 0xbef   :  { %v830_v5 = vpop.permute.xlu0 %829 }
 0xbf0   :  { %v2254_v6 = vmul.f32 %v1955_v60, %v830_v5 }
 0xbf2   :  { %v843_v7 = vrot.slane %v2254_v6, 4 }
 0xbf4   :  { %844 = vrot.lane.b32.xlu1 %v843_v7, %s2027_s7 }
 0xc66   :  { %v845_v8 = vpop.permute.xlu1 %844 }
 0xc67   :  { %1751 = vmatmul.mubr.msk.f32.vlgmr.msra.gmra.mrb[8].mxu0 %vm241_vm5, %v845_v8 }
 0xc68   :  { %1891 = vmatpush3.bf16.msra.mxu0 %v2169_v41  ;;  %1772 = vmatprep.mubr.msk.f32.mxu0 %vm2024_vm0, %v2025_v10 }
 0xc69   :  { %1892 = vmatprep.subr.bf16.mxu0 %v2023_v3 }
 0xc6c   :  { %1894 = vmatpush3.bf16.msra.mxu0 %v2182_v45 }
 0xc6d   :  { %1901 = vmatprep.subr.bf16.mxu0 %v2023_v3 }
 0xd3a   :  { %v914_v9 = vpop.f32.mrb[8].mxu0 }
 0xd3b   :  { %v919_v11 = vrot.slane %v914_v9, 2  ;;  %v1752_v12 = vpop.f32.mrb[9].mxu0 }
 0xd3d   :  { %v921_v13 = vadd.f32 %v919_v11, %v2208_v55 }
 0xd3f   :  { %1958 = vtanh.f32 %v921_v13  ;;  %v1549_v15 = vmul.f32 -1.442695, %v921_v13 }
 0xd41   :  { %1960 = vpow2.f32 %v1549_v15 }
 0xd49   :  { %v1959_v14 = vpop.eup %1958 }
 0xd4a   :  { %934 = vrot.lane.b32.xlu0 %v1959_v14, %s2026_s19 }
 0xd4b   :  { %v1961_v16 = vpop.eup %1960 }
 0xd4c   :  { %v925_v17 = vadd.f32 1.0, %v1961_v16 }
 0xd4e   :  { %1962 = vrcp.f32 %v925_v17 }
 0xd58   :  { %v1963_v18 = vpop.eup %1962 }
 0xd59   :  { %v932_v22 = vmul.f32 %v1963_v18, %v930_v21 }
 0xdbc   :  { %v935_v19 = vpop.permute.xlu0 %934 }
 0xdbd   :  { %v937_v20 = vmul.f32 %v1963_v18, %v935_v19 }
 0xdbf   :  { %939 = vrot.lane.b32.xlu1 %v937_v20, %s2027_s7 }
 0xe31   :  { %v940_v23 = vpop.permute.xlu1 %939 }
 0xe32   :  { %v942_v24 = vadd.f32 %v940_v23, %v932_v22 }
 0xe34   :  { %1964 = vtanh.f32 %v942_v24  ;;  %v1043_v39 = vrot.slane %v942_v24, 6 }
 0xe3e   :  { %v1965_v55 = vpop.eup %1964 }
 0xe3f   :  { %945 = vrot.lane.b32.xlu0 %v1965_v55, %s2026_s19 }
 0xeb1   :  { %v946_v25 = vpop.permute.xlu0 %945 }
 0xeb2   :  { %v2269_v26 = vmul.f32 %v1963_v18, %v946_v25 }
 0xeb4   :  { %v959_v27 = vrot.slane %v2269_v26, 6 }
 0xeb6   :  { %960 = vrot.lane.b32.xlu1 %v959_v27, %s2027_s7 }
 0xf28   :  { %v961_v28 = vpop.permute.xlu1 %960 }
 0xf29   :  { %1762 = vmatmul.mubr.msk.f32.vlgmr.msra.gmra.mrb[6].mxu1 %vm241_vm5, %v961_v28 }
 0xf2a   :  { %1897 = vmatpush3.bf16.msra.mxu1 %v2169_v41  ;;  %1783 = vmatprep.mubr.msk.f32.mxu1 %vm2024_vm0, %v2025_v10 }
 0xf2b   :  { %1898 = vmatprep.subr.bf16.mxu1 %v2023_v3 }
 0xf2e   :  { %1900 = vmatpush3.bf16.msra.mxu1 %v2182_v45 }
 0xf2f   :  { %1907 = vmatprep.subr.bf16.mxu1 %v2023_v3 }
 0xffc   :  { %v1030_v29 = vpop.f32.mrb[6].mxu1 }
 0xffd   :  { %v1034_v30 = vadd.f32 %v1030_v29, %v2206_v53  ;;  %v1763_v31 = vpop.f32.mrb[7].mxu1 }
 0xfff   :  { %1966 = vtanh.f32 %v1034_v30  ;;  %v1551_v33 = vmul.f32 -1.442695, %v1034_v30 }
0x1001   :  { %1968 = vpow2.f32 %v1551_v33 }
0x1009   :  { %v1967_v32 = vpop.eup %1966 }
0x100a   :  { %1047 = vrot.lane.b32.xlu0 %v1967_v32, %s2026_s19 }
0x100b   :  { %v1969_v34 = vpop.eup %1968 }
0x100c   :  { %v1038_v35 = vadd.f32 1.0, %v1969_v34 }
0x100e   :  { %1970 = vrcp.f32 %v1038_v35 }
0x1018   :  { %v1971_v36 = vpop.eup %1970 }
0x1019   :  { %v1045_v40 = vmul.f32 %v1971_v36, %v1043_v39 }
0x107c   :  { %v1048_v37 = vpop.permute.xlu0 %1047 }
0x107d   :  { %v1050_v38 = vmul.f32 %v1971_v36, %v1048_v37 }
0x107f   :  { %1052 = vrot.lane.b32.xlu1 %v1050_v38, %s2027_s7 }
0x10f1   :  { %v1053_v42 = vpop.permute.xlu1 %1052 }
0x10f2   :  { %v1055_v43 = vadd.f32 %v1053_v42, %v1045_v40 }
0x10f4   :  { %1972 = vtanh.f32 %v1055_v43 }
0x10fe   :  { %v1973_v44 = vpop.eup %1972 }
0x10ff   :  { %1058 = vrot.lane.b32.xlu0 %v1973_v44, %s2026_s19  ;;  %v1412_v44 = vld [vmem:[%s2370_s8] sm:$0xff] }
0x1171   :  { %v1059_v46 = vpop.permute.xlu0 %1058 }
0x1172   :  { %v1061_v48 = vmul.f32 %v1971_v36, %v1059_v46  ;;  %v1413_v46 = vld [vmem:[%s2370_s8 + $0x8] sm:$0xff] }
0x1174   :  { %1063 = vrot.lane.b32.xlu1 %v1061_v48, %s2027_s7  ;;  %v1908_v48 = vpack.c.bf16 %v1413_v46, %v1412_v44 }
0x11e6   :  { %v1064_v49 = vpop.permute.xlu1 %1063 }
0x11e7   :  { %1066 = vst.msk [vmem:[#allocation2 + $0xa] sm:$0x3] %vm502_vm6, %v1064_v49  ;;  %1773 = vmatmul.mubr.msk.f32.vlgmr.msra.gmra.mrb[10].mxu0 %vm241_vm5, %v1064_v49  ;;  %v1415_v49 = vld [vmem:[%s2370_s8 + $0x18] sm:$0xff] }
0x11e8   :  { %1903 = vmatpush3.bf16.msra.mxu0 %v2169_v41  ;;  %1794 = vmatprep.mubr.msk.f32.mxu0 %vm2024_vm0, %v2025_v10 }
0x11e9   :  { %1904 = vmatprep.subr.bf16.mxu0 %v2023_v3 }
0x11ec   :  { %1906 = vmatpush3.bf16.msra.mxu0 %v2182_v45  ;;  %v1155_v45 = vrot.slane %v1055_v43, 6 }
0x12ba   :  { %v1139_v50 = vpop.f32.mrb[10].mxu0 }
0x12bb   :  { %v1144_v51 = vrot.slane %v1139_v50, 6  ;;  %v1774_v52 = vpop.f32.mrb[11].mxu0 }
0x12bd   :  { %v1146_v54 = vadd.f32 %v1144_v51, %v2206_v53 }
0x12bf   :  { %1974 = vtanh.f32 %v1146_v54  ;;  %v1553_v57 = vmul.f32 -1.442695, %v1146_v54 }
0x12c1   :  { %1976 = vpow2.f32 %v1553_v57 }
0x12c9   :  { %v1975_v56 = vpop.eup %1974 }
0x12ca   :  { %1159 = vrot.lane.b32.xlu0 %v1975_v56, %s2026_s19 }
0x12cb   :  { %v1977_v58 = vpop.eup %1976 }
0x12cc   :  { %v1150_v41 = vadd.f32 1.0, %v1977_v58 }
0x12ce   :  { %1978 = vrcp.f32 %v1150_v41 }
0x12d8   :  { %v1979_v59 = vpop.eup %1978 }
0x12d9   :  { %v1157_v62 = vmul.f32 %v1979_v59, %v1155_v45 }
0x133c   :  { %v1160_v60 = vpop.permute.xlu0 %1159 }
0x133d   :  { %v1162_v61 = vmul.f32 %v1979_v59, %v1160_v60 }
0x133f   :  { %1164 = vrot.lane.b32.xlu1 %v1162_v61, %s2027_s7  ;;  %v1558_v61 = vld [vmem:[%s2371_s9] ss:$0 sm:$0xff] }
0x13b1   :  { %v1165_v63 = vpop.permute.xlu1 %1164 }
0x13b2   :  { %v1167_v0 = vadd.f32 %v1165_v63, %v1157_v62 }
0x13b4   :  { %1980 = vtanh.f32 %v1167_v0  ;;  %v1270_v20 = vrot.slane %v1167_v0, 6 }
0x13be   :  { %v1981_v1 = vpop.eup %1980 }
0x13bf   :  { %1170 = vrot.lane.b32.xlu0 %v1981_v1, %s2026_s19 }
0x1431   :  { %v1171_v2 = vpop.permute.xlu0 %1170 }
0x1432   :  { %v2296_v4 = vmul.f32 %v1979_v59, %v1171_v2 }
0x1434   :  { %v1183_v5 = vrot.slane %v2296_v4, 2 }
0x1436   :  { %1184 = vrot.lane.b32.xlu1 %v1183_v5, %s2027_s7 }
0x14a8   :  { %v1185_v7 = vpop.permute.xlu1 %1184 }
0x14a9   :  { %1784 = vmatmul.mubr.msk.f32.vlgmr.msra.gmra.mrb[8].mxu1 %vm241_vm5, %v1185_v7 }
0x14aa   :  { %1805 = vmatprep.mubr.msk.f32.mxu1 %vm2024_vm0, %v2025_v10  ;;  %1909 = vmatpush3.bf16.msra.mxu1 %v1908_v48 }
0x14ab   :  { %1910 = vmatprep.subr.bf16.mxu1 %v2023_v3 }
0x157c   :  { %v1254_v8 = vpop.f32.mrb[8].mxu1 }
0x157d   :  { %v1259_v9 = vrot.slane %v1254_v8, 4  ;;  %v1785_v11 = vpop.f32.mrb[9].mxu1 }
0x157f   :  { %v1261_v12 = vadd.f32 %v1259_v9, %v2206_v53 }
0x1581   :  { %1982 = vtanh.f32 %v1261_v12  ;;  %v1555_v14 = vmul.f32 -1.442695, %v1261_v12 }
0x1583   :  { %1984 = vpow2.f32 %v1555_v14 }
0x158b   :  { %v1983_v13 = vpop.eup %1982 }
0x158c   :  { %1274 = vrot.lane.b32.xlu0 %v1983_v13, %s2026_s19 }
0x158d   :  { %v1985_v15 = vpop.eup %1984 }
0x158e   :  { %v1265_v16 = vadd.f32 1.0, %v1985_v15 }
0x1590   :  { %1986 = vrcp.f32 %v1265_v16 }
0x159a   :  { %v1987_v17 = vpop.eup %1986 }
0x159b   :  { %v1272_v21 = vmul.f32 %v1987_v17, %v1270_v20 }
0x15fe   :  { %v1275_v18 = vpop.permute.xlu0 %1274 }
0x15ff   :  { %v1277_v19 = vmul.f32 %v1987_v17, %v1275_v18 }
0x1601   :  { %1279 = vrot.lane.b32.xlu1 %v1277_v19, %s2027_s7 }
0x1673   :  { %v1280_v22 = vpop.permute.xlu1 %1279 }
0x1674   :  { %v1282_v23 = vadd.f32 %v1280_v22, %v1272_v21 }
0x1676   :  { %1988 = vtanh.f32 %v1282_v23 }
0x1680   :  { %v1989_v24 = vpop.eup %1988 }
0x1681   :  { %1285 = vrot.lane.b32.xlu0 %v1989_v24, %s2026_s19 }
0x16f3   :  { %v1286_v55 = vpop.permute.xlu0 %1285 }
0x16f4   :  { %v1288_v25 = vmul.f32 %v1987_v17, %v1286_v55 }
0x16f6   :  { %v1298_v27 = vrot.slane %v1288_v25, 4 }
0x16f8   :  { %1299 = vrot.lane.b32.xlu1 %v1298_v27, %s2027_s7 }
0x176a   :  { %v1300_v28 = vpop.permute.xlu1 %1299 }
0x176b   :  { %1795 = vmatmul.mubr.msk.f32.vlgmr.msra.gmra.mrb[12].mxu0 %vm241_vm5, %v1300_v28 }
0x183e   :  { %v1369_v29 = vpop.f32.mrb[12].mxu0 }
0x183f   :  { %v1374_v30 = vrot.slane %v1369_v29, 2  ;;  %v1796_v31 = vpop.f32.mrb[13].mxu0 }
0x1841   :  { %v1376_v32 = vadd.f32 %v1374_v30, %v2206_v53  ;;  %v1385_v53 = vrot.slane %v1282_v23, 6 }
0x1843   :  { %1990 = vtanh.f32 %v1376_v32  ;;  %v1557_v34 = vmul.f32 -1.442695, %v1376_v32 }
0x1845   :  { %1992 = vpow2.f32 %v1557_v34 }
0x184d   :  { %v1991_v33 = vpop.eup %1990 }
0x184e   :  { %1389 = vrot.lane.b32.xlu0 %v1991_v33, %s2026_s19 }
0x184f   :  { %v1993_v35 = vpop.eup %1992 }
0x1850   :  { %v1380_v36 = vadd.f32 1.0, %v1993_v35 }
0x1852   :  { %1994 = vrcp.f32 %v1380_v36 }
0x185c   :  { %v1995_v37 = vpop.eup %1994 }
0x185d   :  { %v1387_v40 = vmul.f32 %v1995_v37, %v1385_v53 }
0x18c0   :  { %v1390_v38 = vpop.permute.xlu0 %1389 }
0x18c1   :  { %v1392_v39 = vmul.f32 %v1995_v37, %v1390_v38 }
0x18c3   :  { %1394 = vrot.lane.b32.xlu1 %v1392_v39, %s2027_s7 }
0x18c7   :  { %718 = vrot.lane.b32.xlu1 %v2239_v47, %s2027_s7 }
0x18cb   :  { %950 = vrot.lane.b32.xlu1 %v2269_v26, %s2027_s7  ;;  %v1414_v26 = vld [vmem:[%s2370_s8 + $0x10] sm:$0xff] }
0x18cc   :  { %v1911_v51 = vpack.c.bf16 %v1415_v49, %v1414_v26 }
0x18ce   :  { %1912 = vmatpush3.bf16.msra.mxu1 %v1911_v51 }
0x18cf   :  { %1290 = vrot.lane.b32.xlu1 %v1288_v25, %s2027_s7 }
0x1935   :  { %v1395_v42 = vpop.permute.xlu1 %1394 }
0x1936   :  { %v1397_v43 = vadd.f32 %v1395_v42, %v1387_v40 }
0x1938   :  { %1996 = vtanh.f32 %v1397_v43 }
0x1939   :  { %v719_v47 = vpop.permute.xlu1 %718 }
0x193a   :  { %722 = vst.msk [vmem:[#allocation2 + $0x2] sm:$0xc] %vm721_vm7, %v719_v47 }
0x193d   :  { %v951_v50 = vpop.permute.xlu1 %950 }
0x193e   :  { %954 = vst.msk [vmem:[#allocation2 + $0x2] sm:$0xc0] %vm953_vm8, %v951_v50 }
0x1941   :  { %v1291_v52 = vpop.permute.xlu1 %1290 }
0x1942   :  { %v1997_v54 = vpop.eup %1996  ;;  %1293 = vst.msk [vmem:[#allocation2 + $0xa] sm:$0x30] %vm837_vm9, %v1291_v52 }
0x1943   :  { %1400 = vrot.lane.b32.xlu0 %v1997_v54, %s2026_s19 }
0x1947   :  { %834 = vrot.lane.b32.xlu0 %v2254_v6, %s2027_s7 }
0x194b   :  { %1175 = vrot.lane.b32.xlu0 %v2296_v4, %s2027_s7 }
0x19b5   :  { %v1401_v3 = vpop.permute.xlu0 %1400 }
0x19b6   :  { %v1403_v56 = vmul.f32 %v1995_v37, %v1401_v3 }
0x19b8   :  { %1405 = vrot.lane.b32.xlu0 %v1403_v56, %s2027_s7 }
0x19b9   :  { %v835_v57 = vpop.permute.xlu0 %834 }
0x19ba   :  { %838 = vst.msk [vmem:[#allocation2 + $0x2] sm:$0x30] %vm837_vm9, %v835_v57 }
0x19bd   :  { %v1176_v58 = vpop.permute.xlu0 %1175 }
0x19be   :  { %1178 = vst.msk [vmem:[#allocation2 + $0xa] sm:$0xc] %vm721_vm7, %v1176_v58 }
0x19c1   :  { %v1409_v41 = vld [vmem:[#allocation2] sm:$0xff] }
0x19c2   :  { %1806 = vmatmul.mubr.msk.f32.vlgmr.msra.gmra.mrb[10].mxu1 %vm241_vm5, %v1409_v41 }
0x19c3   :  { %1808 = vmatprep.mubr.msk.f32.mxu1 %vm2024_vm0, %v2025_v10 }
0x19c5   :  { %v1410_v59 = vld [vmem:[#allocation2 + $0x8] sm:$0xff] }
0x19c6   :  { %1809 = vmatmul.mubr.msk.f32.gmra.mrb[12].mxu1 %vm241_vm5, %v1410_v59 }
0x19c7   :  { %1811 = vmatprep.mubr.msk.f32.mxu1 %vm2024_vm0, %v2025_v10 }
0x1a2a   :  { %v1406_v6 = vpop.permute.xlu0 %1405 }
0x1a2b   :  { %1408 = vst.msk [vmem:[#allocation2 + $0xa] sm:$0xc0] %vm953_vm8, %v1406_v6 }
0x1a32   :  { %v1411_v60 = vld [vmem:[#allocation2 + $0x10] sm:$0x3] }
0x1a33   :  { %1812 = vmatmul.mubr.msk.f32.gmra.mrb[14].mxu1 %vm241_vm5, %v1411_v60 }
0x1a95   :  { %v1498_v45 = vpop.f32.mrb[10].mxu1 }
0x1a96   :  { %v1499_v62 = vadd.f32 %v1558_v61, %v1498_v45  ;;  %v1807_v63 = vpop.f32.mrb[11].mxu1 }
0x1a98   :  { %1512 = vst [vmem:[#allocation3] sm:$0xff] %v1499_v62 }
0x1a99   :  { %v1503_v0 = vpop.f32.mrb[12].mxu1 }
0x1a9a   :  { %v1504_v1 = vadd.f32 %v1558_v61, %v1503_v0  ;;  %v1810_v2 = vpop.f32.mrb[13].mxu1 }
0x1a9c   :  { %1513 = vst [vmem:[#allocation3 + $0x8] sm:$0xff] %v1504_v1 }
0x1b06   :  { %v1508_v10 = vpop.f32.mrb[14].mxu1 }
0x1b07   :  { %v1509_v4 = vadd.f32 %v1558_v61, %v1508_v10  ;;  %v1813_v5 = vpop.f32.mrb[15].mxu1 }
0x1b09   :  { %1514 = vst [vmem:[#allocation3 + $0x10] sm:$0x3] %v1509_v4 }
0x1b0a   :  { %2009 = shalt.err (!%p2006_p4)
}
0x1b0b   :  { %s2010_s30 = scalar_lea.hbm %s2372_s10, 384 }
0x1b0c   :  { %p2011_p5 = scmp.ne.s32.totalorder %s2372_s10, %s2010_s30  ;;  %p2014_p6 = scmp.lt.u32.totalorder %s2010_s30, %s2372_s10 }
0x1b0e   :  { %p2016_p7 = pnand %p2014_p6, %p2011_p5 }
0x1b10   :  { %2019 = shalt.err (!%p2016_p7)
}
0x1b11   :  { %s2029_s14 = smov 128   ;;  %s2030_s15 = smov 8  }
0x1b12   :  { %1526 = dma.vmem_to_hbm [thread:$0]  %s1521_s4, 384, %s2372_s10, [#allocation4], %s2029_s14, %s2029_s14, %s2030_s15  }
0x1b13   :  { %2020 = dma.done.wait [#allocation4], 384  }
0x1b14   :  { %2021 = vsyncadd [#allocation4], 4294966912 }
0x1b15   :  { %1530 = vsyncpa [#allocation4], 1 }

</bundles_post_ra>
